<compile_context>
chip_gen: v7x
topology: tpu7x:2x2x1
jax: 0.10.0
libtpu: 0.0.40
codegen_flags: <defaults>
</compile_context>

<pallas_src>
import functools

import jax
import jax.numpy as jnp
from jax.experimental import pallas as pl
from jax.experimental.pallas import tpu as pltpu

EMB_SIZE = 512           # `embedding_size` in the PyTorch source
MAX_ROWS_PER_STEP = 256  # embedding rows gathered per grid step (output tile rows)
NUM_DMA_SEMS = 16        # DMA-completion semaphores, shared round-robin by rows


def _round_up(x, m):
    return (x + m - 1) // m * m


# ---------------------------------------------------------------------------
# Kernel: one grid step gathers `rows_per_step` embedding rows HBM -> the
# (rows_per_step, emb) output VMEM tile via per-row async DMAs.
# ---------------------------------------------------------------------------
def _emb_gather_kernel(ids_ref, table_ref, out_ref, sems, *, rows_per_step):
    base = pl.program_id(0) * rows_per_step

    # Issue every row DMA first so they all overlap (hides HBM latency).
    @pl.loop(0, rows_per_step)
    def _(g):
        tok = ids_ref[base + g]
        pltpu.make_async_copy(
            table_ref.at[pl.ds(tok, 1), :],
            out_ref.at[pl.ds(g, 1), :],
            sems.at[g % NUM_DMA_SEMS],
        ).start()

    # Then wait for all of them.  Every row copy has identical size, so one
    # wait per issued copy on the shared semaphores is exact.
    @pl.loop(0, rows_per_step)
    def _(g):
        pltpu.make_async_copy(
            table_ref.at[pl.ds(0, 1), :],
            out_ref.at[pl.ds(g, 1), :],
            sems.at[g % NUM_DMA_SEMS],
        ).wait()


def embedding_forward(emb_table, tokens):
    """nn.Embedding forward: tokens (B, S) int -> (B, S, emb) in table dtype."""
    batch, seq = tokens.shape
    vocab, emb_size = emb_table.shape

    n_tok = batch * seq
    rows_per_step = min(MAX_ROWS_PER_STEP, _round_up(n_tok, 8))
    n_steps = pl.cdiv(n_tok, rows_per_step)
    n_ids = n_steps * rows_per_step

    ids = jnp.clip(tokens.reshape(-1).astype(jnp.int32), 0, vocab - 1)
    if n_ids != n_tok:
        # Pad ids with a valid index so SMEM reads stay in bounds; the
        # corresponding tail rows of the ragged last output block are clipped
        # by the pipeline writeback, so no post-kernel slice is needed.
        ids = jnp.pad(ids, (0, n_ids - n_tok))

    out = pl.pallas_call(
        functools.partial(_emb_gather_kernel, rows_per_step=rows_per_step),
        out_shape=jax.ShapeDtypeStruct((n_tok, emb_size), emb_table.dtype),
        grid_spec=pltpu.PrefetchScalarGridSpec(
            num_scalar_prefetch=1,
            grid=(n_steps,),
            in_specs=[pl.BlockSpec(memory_space=pl.ANY)],  # table stays in HBM
            out_specs=pl.BlockSpec((rows_per_step, emb_size),
                                   lambda i, ids_ref: (i, 0)),
            scratch_shapes=[pltpu.SemaphoreType.DMA((NUM_DMA_SEMS,))],
        ),
        compiler_params=pltpu.CompilerParams(
            dimension_semantics=("parallel",)),
    )(ids, emb_table)

    return out.reshape(batch, seq, emb_size)


# ---------------------------------------------------------------------------
# Parameter init mirroring nn.Embedding(vocab, emb, padding_idx):
# weight ~ N(0, 1); padding row zeroed (that is all padding_idx does at
# forward time -- the lookup itself is unchanged).
# ---------------------------------------------------------------------------
def init_embedding(key, vocab_size, padding_idx, emb_size=EMB_SIZE):
    w = jax.random.normal(key, (vocab_size, emb_size), jnp.float32)
    return w.at[padding_idx].set(0.0)


if __name__ == "__main__":
    vocab_size = 50
    padding_idx = 0

    key = jax.random.PRNGKey(0)
    wkey, tkey, tkey2 = jax.random.split(key, 3)
    emb_table = init_embedding(wkey, vocab_size, padding_idx)

    fwd = jax.jit(embedding_forward)

    # Small shape from the module spec: (batch=2, seq=16).
    tokens = jax.random.randint(tkey, (2, 16), 0, vocab_size, dtype=jnp.int32)
    out = fwd(emb_table, tokens)
    jax.block_until_ready(out)
    assert out.shape == (2, 16, EMB_SIZE)
    assert out.dtype == emb_table.dtype
    ref = jnp.take(emb_table, tokens, axis=0)
    assert bool(jnp.allclose(out, ref)), "Pallas gather mismatch vs reference"

    # Second shape exercising multiple grid steps and a ragged last block.
    tokens2 = jax.random.randint(tkey2, (3, 100), 0, vocab_size, dtype=jnp.int32)
    out2 = fwd(emb_table, tokens2)
    jax.block_until_ready(out2)
    ref2 = jnp.take(emb_table, tokens2, axis=0)
    assert out2.shape == (3, 100, EMB_SIZE)
    assert bool(jnp.allclose(out2, ref2)), "Pallas gather mismatch (ragged case)"

    print("KERNEL_OK")
</pallas_src>

<mosaic_0001>
module attributes {stable_mosaic.version = 11 : i64} {
  func.func @_emb_gather_kernel(%arg0: i32, %arg1: memref<32xi32, #tpu.memory_space<smem>>, %arg2: memref<50x512xf32, #tpu.memory_space<any>>, %arg3: memref<32x512xf32, #tpu.memory_space<vmem>>, %arg4: memref<16x!tpu.dma_semaphore, #tpu.memory_space<semaphore_mem>>) attributes {dimension_semantics = [#tpu.dimension_semantics<parallel>], iteration_bounds = array<i64: 1>, scalar_prefetch = 1 : i64, scratch_operands = 1 : i64, tpu.core_type = #tpu.core_type<tc>, window_params = [{}, {transform_indices = @transform_1, window_bounds = array<i64: 32, 512>}]} {
    %c32_i32 = arith.constant 32 : i32
    %0 = arith.muli %arg0, %c32_i32 : i32
    %c0_i32 = arith.constant 0 : i32
    %c32_i32_0 = arith.constant 32 : i32
    %1 = arith.addi %c0_i32, %c32_i32_0 : i32
    %c1_i32 = arith.constant 1 : i32
    scf.for %arg5 = %c0_i32 to %1 step %c1_i32  : i32 {
      %c1_i32_6 = arith.constant 1 : i32
      %3 = arith.muli %arg5, %c1_i32_6 : i32
      %c0_i32_7 = arith.constant 0 : i32
      %4 = arith.addi %c0_i32_7, %3 : i32
      %5 = arith.addi %0, %4 : i32
      %6 = arith.index_cast %5 : i32 to index
      %7 = memref.load %arg1[%6] : memref<32xi32, #tpu.memory_space<smem>>
      %c16_i32 = arith.constant 16 : i32
      %c0_i32_8 = arith.constant 0 : i32
      %8 = arith.cmpi eq, %c16_i32, %c0_i32_8 : i32
      %c1_i32_9 = arith.constant 1 : i32
      %9 = arith.select %8, %c1_i32_9, %c16_i32 : i32
      %10 = arith.remsi %4, %9 : i32
      %c0_i32_10 = arith.constant 0 : i32
      %11 = arith.cmpi ne, %10, %c0_i32_10 : i32
      %c0_i32_11 = arith.constant 0 : i32
      %12 = arith.cmpi slt, %10, %c0_i32_11 : i32
      %c0_i32_12 = arith.constant 0 : i32
      %13 = arith.cmpi slt, %9, %c0_i32_12 : i32
      %14 = arith.xori %12, %13 : i1
      %15 = arith.andi %14, %11 : i1
      %16 = arith.addi %10, %9 : i32
      %17 = arith.select %15, %16, %10 : i32
      %c0_i32_13 = arith.constant 0 : i32
      %18 = tpu.memref_slice %arg2[%7, %c0_i32_13] : memref<50x512xf32, #tpu.memory_space<any>> -> memref<1x512xf32, #tpu.memory_space<any>>
      %c0_i32_14 = arith.constant 0 : i32
      %19 = tpu.memref_slice %arg3[%4, %c0_i32_14] : memref<32x512xf32, #tpu.memory_space<vmem>> -> memref<1x512xf32, #tpu.memory_space<vmem>>
      %20 = tpu.memref_slice %arg4[%17] : memref<16x!tpu.dma_semaphore, #tpu.memory_space<semaphore_mem>> -> memref<1x!tpu.dma_semaphore, #tpu.memory_space<semaphore_mem>>
      %21 = tpu.memref_squeeze %20 : memref<1x!tpu.dma_semaphore, #tpu.memory_space<semaphore_mem>> -> memref<!tpu.dma_semaphore, #tpu.memory_space<semaphore_mem>>
      tpu.enqueue_dma source(%18 : memref<1x512xf32, #tpu.memory_space<any>>) target(%19 : memref<1x512xf32, #tpu.memory_space<vmem>>) target_semaphore(%21 : memref<!tpu.dma_semaphore, #tpu.memory_space<semaphore_mem>>)
    }
    %c32_i32_1 = arith.constant 32 : i32
    %c0_i32_2 = arith.constant 0 : i32
    %c32_i32_3 = arith.constant 32 : i32
    %2 = arith.addi %c0_i32_2, %c32_i32_3 : i32
    %c1_i32_4 = arith.constant 1 : i32
    scf.for %arg5 = %c0_i32_2 to %2 step %c1_i32_4  : i32 {
      %c1_i32_6 = arith.constant 1 : i32
      %3 = arith.muli %arg5, %c1_i32_6 : i32
      %c0_i32_7 = arith.constant 0 : i32
      %4 = arith.addi %c0_i32_7, %3 : i32
      %c16_i32 = arith.constant 16 : i32
      %c0_i32_8 = arith.constant 0 : i32
      %5 = arith.cmpi eq, %c16_i32, %c0_i32_8 : i32
      %c1_i32_9 = arith.constant 1 : i32
      %6 = arith.select %5, %c1_i32_9, %c16_i32 : i32
      %7 = arith.remsi %4, %6 : i32
      %c0_i32_10 = arith.constant 0 : i32
      %8 = arith.cmpi ne, %7, %c0_i32_10 : i32
      %c0_i32_11 = arith.constant 0 : i32
      %9 = arith.cmpi slt, %7, %c0_i32_11 : i32
      %c0_i32_12 = arith.constant 0 : i32
      %10 = arith.cmpi slt, %6, %c0_i32_12 : i32
      %11 = arith.xori %9, %10 : i1
      %12 = arith.andi %11, %8 : i1
      %13 = arith.addi %7, %6 : i32
      %14 = arith.select %12, %13, %7 : i32
      %c0_i32_13 = arith.constant 0 : i32
      %c0_i32_14 = arith.constant 0 : i32
      %15 = tpu.memref_slice %arg2[%c0_i32_13, %c0_i32_14] : memref<50x512xf32, #tpu.memory_space<any>> -> memref<1x512xf32, #tpu.memory_space<any>>
      %c0_i32_15 = arith.constant 0 : i32
      %16 = tpu.memref_slice %arg3[%4, %c0_i32_15] : memref<32x512xf32, #tpu.memory_space<vmem>> -> memref<1x512xf32, #tpu.memory_space<vmem>>
      %17 = tpu.memref_slice %arg4[%14] : memref<16x!tpu.dma_semaphore, #tpu.memory_space<semaphore_mem>> -> memref<1x!tpu.dma_semaphore, #tpu.memory_space<semaphore_mem>>
      %18 = tpu.memref_squeeze %17 : memref<1x!tpu.dma_semaphore, #tpu.memory_space<semaphore_mem>> -> memref<!tpu.dma_semaphore, #tpu.memory_space<semaphore_mem>>
      tpu.wait_dma2 semaphore(%18 : memref<!tpu.dma_semaphore, #tpu.memory_space<semaphore_mem>>) src(%15 : memref<1x512xf32, #tpu.memory_space<any>>) dst(%16 : memref<1x512xf32, #tpu.memory_space<vmem>>)
    }
    %c32_i32_5 = arith.constant 32 : i32
    return
  }
  func.func @transform_1(%arg0: i32, %arg1: memref<32xi32, #tpu.memory_space<smem>>) -> (i32, i32) {
    %c0_i32 = arith.constant 0 : i32
    %c0_i32_0 = arith.constant 0 : i32
    return %arg0, %c0_i32 : i32, i32
  }
}

</mosaic_0001>

<bundles_post_ra>
// kernel: embedding_forward.1
= control target key start
LH: loop header
LB: loop body
LE: loop exit
PB: predicated region body
PF: predicated region fallthrough
CT: control target
= control target key end

     0   :  { %s436_s0 = inlined_call_operand.vmem [shape: s32[32], index: 0, kind: input, shape index: {}]   ;;  %s437_s1 = inlined_call_operand.hbm [shape: f32[50,512], index: 1, kind: input, shape index: {}]   ;;  %s438_s2 = inlined_call_operand.hbm [shape: f32[32,512], index: 2, kind: output, shape index: {}]  }
   0x1   :  { %s7_s11 = sshll.u32 %s436_s0, 4  ;;  %s8_s11 = int_to_ptr.vmem [resolvable:$true] %s7_s11 }
   0x2   :  { %s267_s12 = scalar_lea.vmem %s8_s11, 16  ;;  %p272_p1 = scmp.lt.s32.totalorder %s8_s11, %s8_s11 }
   0x3   :  { %p268_p0 = scmp.ne.s32.totalorder %s8_s11, %s267_s12  ;;  %p273_p2 = scmp.lt.s32.totalorder %s267_s12, %s267_s12 }
   0x5   :  { %p274_p3 = por %p273_p2, %p272_p1 }
   0x7   :  { %p275_p4 = pnand %p274_p3, %p268_p0 }
   0x9   :  { %278 = shalt.err (!%p275_p4)  }
   0xa   :  { %s347_s13 = smov [#allocation4]  }
   0xb   :  { %10 = dma.vmem_to_smem %s8_s11, 16, %s347_s13, [#allocation3] }
   0xc   :  { %333 = dma.done.wait [#allocation3], 16 }
   0xd   :  { %334 = vsyncadd [#allocation3], 4294967280 }
   0xe   :  { %12 = sfence }
   0xf   :  { %13 = vsyncpa [#allocation6], 0  ;;  %s371_s14 = smov 0  }
  0x10 LB: > { %s22_s0 = sld [smem:[#allocation4 + %s341_s14]]  ;;  %p23_p5 = scmp.lt.s32.totalorder %s341_s14, 0  ;;  %s341_s14 = sphi %s371_s14, %s20_s14  }
  0x11   : > { %s24_s15 = ssub.s32 0, %s341_s14  ;;  %s41_s16 = sshrl.u32 %s341_s14, 3 }
  0x12   : > { %s220_s17 = smin.u32 %s341_s14, %s24_s15  ;;  %s42_s18 = sand.u32 7, %s341_s14  }
  0x13   : > { %s26_s19 = sand.u32 15, %s220_s17   ;;  %s225_s20 = sshll.u32 %s41_s16, 5 }
  0x14   : > { %s27_s21 = ssub.s32 0, %s26_s19  ;;  %s44_s22 = sadd.s32 %s225_s20, %s42_s18 }
  0x15   : > { %s440_s21 = smov (!%p23_p5, %s27_s21), %s26_s19  ;;  %s45_s28 = scalar_lea.vmem [#allocation5], %s44_s22 }
  0x16   : > { %s35_s23 = sshrl.u32 %s22_s0, 3  ;;  %s36_s24 = sand.u32 7, %s22_s0  }
  0x17   : > { %p222_p6 = scmp.lt.s32.totalorder %s440_s21, 0  ;;  %s33_s25 = sadd.s32 16, %s440_s21 }
  0x18   : > { %s223_s26 = sshll.u32 %s35_s23, 5  ;;  %s48_s29 = sshll.u32 %s45_s28, 4  ;;  %s389_s29 = int_to_ptr.vmem [resolvable:$true] %s48_s29 }
  0x19   : > { %s442_s25 = smov (!%p222_p6, %s33_s25), %s440_s21  ;;  %s38_s27 = sadd.s32 %s223_s26, %s36_s24 }
  0x1a   : > { %s224_s30 = sshll.u32 %s38_s27, 4  ;;  %s46_s6 = scalar_lea.sflag [#allocation2], %s442_s25 }
  0x1b   : > { %s387_s5 = scalar_lea.hbm %s437_s1, %s224_s30  ;;  %s281_s10 = scalar_lea.hbm %s437_s1, 3584 }
  0x1c   : > { %s279_s7 = scalar_lea.hbm %s387_s5, 64  ;;  %p282_p8 = scmp.lt.u32.totalorder %s387_s5, %s437_s1 }
  0x1d   : > { %p280_p7 = scmp.ne.s32.totalorder %s387_s5, %s279_s7  ;;  %p283_p9 = scmp.lt.u32.totalorder %s281_s10, %s279_s7 }
  0x1e   : > { %p285_p11 = scmp.lt.u32.totalorder %s279_s7, %s387_s5 }
  0x1f   : > { %p284_p10 = por %p283_p9, %p282_p8 }
  0x21   : > { %p286_p12 = por %p285_p11, %p284_p10 }
  0x23   : > { %p287_p13 = pnand %p286_p12, %p280_p7 }
  0x25   : > { %290 = shalt.err (!%p287_p13)  }
  0x26   : > { %s291_s13 = scalar_lea.vmem %s389_s29, 64  ;;  %s348_s0 = smov [#allocation5]  }
  0x27   : > { %p292_p0 = scmp.ne.s32.totalorder %s389_s29, %s291_s13  ;;  %s293_s15 = sshll.u32 %s348_s0, 4  ;;  %s404_s15 = int_to_ptr.vmem [resolvable:$false] %s293_s15 }
  0x28   : > { %s407_s16 = scalar_lea.vmem %s404_s15, 2048  ;;  %p296_p1 = scmp.lt.s32.totalorder %s389_s29, %s404_s15 }
  0x29   : > { %p297_p2 = scmp.lt.s32.totalorder %s407_s16, %s291_s13 }
  0x2b   : > { %p298_p3 = por %p297_p2, %p296_p1 }
  0x2d   : > { %p299_p4 = pnand %p298_p3, %p292_p0 }
  0x2f   : > { %302 = shalt.err (!%p299_p4)  }
  0x30   : > { %s349_s17 = smov 128   ;;  %s350_s18 = smov 1  }
  0x31   : > { %51 = dma.hbm_to_vmem [thread:$0]  %s387_s5, 64, %s389_s29, %s46_s6, %s349_s17, %s349_s17, %s350_s18 }
  0x32   : > { %s20_s14 = sadd.s32 1, %s341_s14  }
  0x33   : > { %p17_p5 = scmp.ge.s32.totalorder %s20_s14, 32  }
  0x34   :  { %s343_s19 = smov (%p17_p5), 0  }
  0x35   :  { %19 = sbr.rel (!%p17_p5) target bundleno = 16 (0x10), region = 53 }
  0x3c LB: > { %p58_p6 = scmp.lt.s32.totalorder %s345_s19, 0  ;;  %s59_s20 = ssub.s32 0, %s345_s19  ;;  %s345_s19 = sphi %s343_s19, %s57_s19  }
  0x3d   : > { %s226_s21 = smin.u32 %s345_s19, %s59_s20 }
  0x3e   : > { %s61_s22 = sand.u32 15, %s226_s21  }
  0x3f   : > { %s62_s23 = ssub.s32 0, %s61_s22 }
  0x40   : > { %s444_s23 = smov (!%p58_p6, %s62_s23), %s61_s22 }
  0x41   : > { %p228_p7 = scmp.lt.s32.totalorder %s444_s23, 0  ;;  %s68_s24 = sadd.s32 16, %s444_s23 }
  0x43   : > { %s446_s24 = smov (!%p228_p7, %s68_s24), %s444_s23 }
  0x44   : > { %s70_s25 = scalar_lea.sflag [#allocation2], %s446_s24 }
  0x45   : > { %335 = dma.done.wait %s70_s25, 64 }
  0x46   : > { %336 = vsyncadd %s70_s25, 4294967232  ;;  %s57_s19 = sadd.s32 1, %s345_s19  }
  0x47   : > { %p54_p8 = scmp.ge.s32.totalorder %s57_s19, 32  }
  0x48   :  { %p304_p9 = scmp.ne.s32.totalorder (%p54_p8), %s404_s15, %s407_s16  ;;  %p308_p10 = scmp.lt.s32.totalorder (%p54_p8), %s404_s15, %s404_s15 }
  0x49   :  { %56 = sbr.rel (!%p54_p8) target bundleno = 60 (0x3c), region = 64  ;;  %p309_p11 = scmp.lt.s32.totalorder (%p54_p8), %s407_s16, %s407_s16 }
  0x4b   :  { %p310_p12 = por (%p54_p8), %p309_p11, %p308_p10 }
  0x4d   :  { %p311_p13 = pnand (%p54_p8), %p310_p12, %p304_p9 }
  0x50   :  { %314 = shalt.err (!%p311_p13)
}
  0x51   :  { %s315_s26 = scalar_lea.hbm %s438_s2, 2048 }
  0x52   :  { %p316_p0 = scmp.ne.s32.totalorder %s438_s2, %s315_s26  ;;  %p319_p1 = scmp.lt.u32.totalorder %s315_s26, %s438_s2 }
  0x54   :  { %p321_p2 = pnand %p319_p1, %p316_p0 }
  0x56   :  { %324 = shalt.err (!%p321_p2)
}
  0x57   :  { %s351_s3 = smov 512   ;;  %s352_s4 = smov 32  }
  0x58   :  { %85 = dma.vmem_to_hbm [thread:$0]  %s404_s15, 2048, %s438_s2, [#allocation6], %s351_s3, %s351_s3, %s352_s4  }
  0x59   :  { %337 = dma.done.wait [#allocation6], 2048  }
  0x5a   :  { %338 = vsyncadd [#allocation6], 4294965248 }
  0x5b   :  { %89 = vsyncpa [#allocation6], 1 }
  0x5c   :  { %90 = vsyncmov [#allocation2] }
  0x5f   :  { %s91_s7 = vpop.sfrf %90 }
  0x60   :  { %p229_p3 = scmp.ne.s32.totalorder %s91_s7, 0 }
  0x62   :  { %95 = shalt.err (%p229_p3)  }
  0x63   :  { %97 = vsyncmov [#allocation2 + $0x1] }
  0x66   :  { %s98_s8 = vpop.sfrf %97 }
  0x67   :  { %p230_p4 = scmp.ne.s32.totalorder %s98_s8, 0 }
  0x69   :  { %102 = shalt.err (%p230_p4)  }
  0x6a   :  { %104 = vsyncmov [#allocation2 + $0x2] }
  0x6d   :  { %s105_s9 = vpop.sfrf %104 }
  0x6e   :  { %p231_p5 = scmp.ne.s32.totalorder %s105_s9, 0 }
  0x70   :  { %109 = shalt.err (%p231_p5)  }
  0x71   :  { %111 = vsyncmov [#allocation2 + $0x3] }
  0x74   :  { %s112_s10 = vpop.sfrf %111 }
  0x75   :  { %p232_p6 = scmp.ne.s32.totalorder %s112_s10, 0 }
  0x77   :  { %116 = shalt.err (%p232_p6)  }
  0x78   :  { %118 = vsyncmov [#allocation2 + $0x4] }
  0x7b   :  { %s119_s2 = vpop.sfrf %118 }
  0x7c   :  { %p233_p7 = scmp.ne.s32.totalorder %s119_s2, 0 }
  0x7e   :  { %123 = shalt.err (%p233_p7)  }
  0x7f   :  { %125 = vsyncmov [#allocation2 + $0x5] }
  0x82   :  { %s126_s11 = vpop.sfrf %125 }
  0x83   :  { %p234_p8 = scmp.ne.s32.totalorder %s126_s11, 0 }
  0x85   :  { %130 = shalt.err (%p234_p8)  }
  0x86   :  { %132 = vsyncmov [#allocation2 + $0x6] }
  0x89   :  { %s133_s12 = vpop.sfrf %132 }
  0x8a   :  { %p235_p9 = scmp.ne.s32.totalorder %s133_s12, 0 }
  0x8c   :  { %137 = shalt.err (%p235_p9)  }
  0x8d   :  { %139 = vsyncmov [#allocation2 + $0x7] }
  0x90   :  { %s140_s13 = vpop.sfrf %139 }
  0x91   :  { %p236_p10 = scmp.ne.s32.totalorder %s140_s13, 0 }
  0x93   :  { %144 = shalt.err (%p236_p10)  }
  0x94   :  { %146 = vsyncmov [#allocation2 + $0x8] }
  0x97   :  { %s147_s0 = vpop.sfrf %146 }
  0x98   :  { %p237_p11 = scmp.ne.s32.totalorder %s147_s0, 0 }
  0x9a   :  { %151 = shalt.err (%p237_p11)  }
  0x9b   :  { %153 = vsyncmov [#allocation2 + $0x9] }
  0x9e   :  { %s154_s15 = vpop.sfrf %153 }
  0x9f   :  { %p238_p12 = scmp.ne.s32.totalorder %s154_s15, 0 }
  0xa1   :  { %158 = shalt.err (%p238_p12)  }
  0xa2   :  { %160 = vsyncmov [#allocation2 + $0xa] }
  0xa5   :  { %s161_s16 = vpop.sfrf %160 }
  0xa6   :  { %p239_p13 = scmp.ne.s32.totalorder %s161_s16, 0 }
  0xa8   :  { %165 = shalt.err (%p239_p13)  }
  0xa9   :  { %167 = vsyncmov [#allocation2 + $0xb] }
  0xac   :  { %s168_s17 = vpop.sfrf %167 }
  0xad   :  { %p240_p0 = scmp.ne.s32.totalorder %s168_s17, 0 }
  0xaf   :  { %172 = shalt.err (%p240_p0)  }
  0xb0   :  { %174 = vsyncmov [#allocation2 + $0xc] }
  0xb3   :  { %s175_s18 = vpop.sfrf %174 }
  0xb4   :  { %p241_p1 = scmp.ne.s32.totalorder %s175_s18, 0 }
  0xb6   :  { %179 = shalt.err (%p241_p1)  }
  0xb7   :  { %181 = vsyncmov [#allocation2 + $0xd] }
  0xba   :  { %s182_s19 = vpop.sfrf %181 }
  0xbb   :  { %p242_p2 = scmp.ne.s32.totalorder %s182_s19, 0 }
  0xbd   :  { %186 = shalt.err (%p242_p2)  }
  0xbe   :  { %188 = vsyncmov [#allocation2 + $0xe] }
  0xc1   :  { %s189_s20 = vpop.sfrf %188 }
  0xc2   :  { %p243_p3 = scmp.ne.s32.totalorder %s189_s20, 0 }
  0xc4   :  { %193 = shalt.err (%p243_p3)  }
  0xc5   :  { %195 = vsyncmov [#allocation2 + $0xf] }
  0xc8   :  { %s196_s21 = vpop.sfrf %195 }
  0xc9   :  { %p244_p4 = scmp.ne.s32.totalorder %s196_s21, 0 }
  0xcb   :  { %200 = shalt.err (%p244_p4)  }

</bundles_post_ra>
